<compile_context>
chip_gen: v7x
topology: tpu7x:2x2x1
jax: 0.10.0
libtpu: 0.0.40
codegen_flags: <defaults>
</compile_context>

<pallas_src>
import functools
import math

import jax
import jax.numpy as jnp
from jax.experimental import pallas as pl
from jax.experimental.pallas import tpu as pltpu


def _round_up(x, m):
    return ((x + m - 1) // m) * m


# -----------------------------------------------------------------------------
# Fused kernel (folded affine chain)
# -----------------------------------------------------------------------------
def _fused_kernel(*refs, num_mems, shrink_thres):
    eps = 1e-12

    if num_mems == 0:
        # Whole model folds to a single affine map.
        x_ref, w_ref, b_ref, recon_ref = refs
        recon_ref[...] = (
            jnp.dot(x_ref[...], w_ref[...], preferred_element_type=jnp.float32)
            + b_ref[...])
        return

    # inputs : x, W0, b0, C_0..C_{num_mems-2}, M_out, b_out
    # outputs: recon [rows, feat], att_stack [num_mems, S, rows] (transposed!)
    x_ref, w0_ref, b0_ref = refs[0], refs[1], refs[2]
    c_refs = refs[3:3 + num_mems - 1]
    mout_ref = refs[2 + num_mems]
    bout_ref = refs[3 + num_mems]
    recon_ref = refs[4 + num_mems]
    att_ref = refs[5 + num_mems]

    # First-memory logits straight from x through the folded fc_in ⊕ mem^T map.
    logits = (jnp.dot(x_ref[...], w0_ref[...], preferred_element_type=jnp.float32)
              + b0_ref[...])                                     # [rows, S]

    att = None
    for m in range(num_mems):                                    # static unroll
        mx = jnp.max(logits, axis=1, keepdims=True)
        e = jnp.exp(logits - mx)
        # softmax denominator: approximate reciprocal rides the EUP slot.
        att = e * pl.reciprocal(jnp.sum(e, axis=1, keepdims=True), approx=True)

        if shrink_thres > 0:
            # hard_shrink_relu: relu(att - lambd) * att / (|att - lambd| + eps)
            shifted = att - shrink_thres
            att = jnp.maximum(shifted, 0.0) * att / (jnp.abs(shifted) + eps)
            # F.normalize(p=1, dim=1): exact divide (correctness over approx).
            denom = jnp.maximum(jnp.sum(jnp.abs(att), axis=1, keepdims=True), eps)
            att = att / denom

        # Lane-dense writeback: store transposed so last dim = rows.
        att_ref[m] = att.T                                       # [S, rows]

        if m < num_mems - 1:
            # Next-memory logits through the folded [S, S] hop matrix.
            logits = jnp.dot(att, c_refs[m][...],
                             preferred_element_type=jnp.float32)

    # fc_out fused with mem_last: recon = att_last @ (mem_last @ W_out^T) + b_out
    recon_ref[...] = (
        jnp.dot(att, mout_ref[...], preferred_element_type=jnp.float32)
        + bout_ref[...])


# -----------------------------------------------------------------------------
# Row tiling
# -----------------------------------------------------------------------------
def _row_tiling(n, target=1024, lane=128):
    """Return (row_block, padded_rows).

    Small N -> one block (rounded up to a multiple of 8).
    Large N -> a lane-multiple tile (<= target) capped at ~N/2 so the grid has
    >= 2 steps and the 'parallel' axis can shard across v7x's two TensorCores.
    """
    if n <= 2 * lane:
        n_pad = _round_up(n, 8)
        return n_pad, n_pad
    n_pad = _round_up(n, lane)
    half = max(lane, ((n_pad // 2) // lane) * lane)
    rb = min(target, half)
    n_pad = _round_up(n, rb)
    return rb, n_pad


# -----------------------------------------------------------------------------
# Pallas wrapper
# -----------------------------------------------------------------------------
def fused_forward(x2d, w0, b0, c_mats, m_out, b_out, num_mems, num_slots,
                  shrink_thres, row_block=None):
    """x2d: [N, feat]. Folded params: w0 [feat,S], b0 [1,S], c_mats list of
    [S,S], m_out [S,feat], b_out [1,feat] (for num_mems==0: w0 [feat,feat],
    b0 [1,feat]). Returns (recon [N,feat], att_stack [M,N,S] | None)."""
    n, feat = x2d.shape
    s = num_slots

    if row_block is not None:
        rb = int(row_block)
        assert rb % 8 == 0, "row_block must be a multiple of 8"
        n_pad = _round_up(n, rb)
    else:
        rb, n_pad = _row_tiling(n)
    if n_pad != n:
        x2d = jnp.pad(x2d, ((0, n_pad - n), (0, 0)))
    grid = (n_pad // rb,)

    x_spec = pl.BlockSpec((rb, feat), lambda i: (i, 0))

    def const_spec(shape):
        return pl.BlockSpec(shape, lambda i: (0, 0))

    if num_mems == 0:
        operands = (x2d, w0, b0)
        in_specs = [x_spec, const_spec(w0.shape), const_spec(b0.shape)]
        out_shape = (jax.ShapeDtypeStruct((n_pad, feat), jnp.float32),)
        out_specs = (pl.BlockSpec((rb, feat), lambda i: (i, 0)),)
        flops = 2 * n_pad * feat * feat
        transcendentals = 0
    else:
        operands = (x2d, w0, b0, *c_mats, m_out, b_out)
        in_specs = ([x_spec, const_spec(w0.shape), const_spec(b0.shape)]
                    + [const_spec(c.shape) for c in c_mats]
                    + [const_spec(m_out.shape), const_spec(b_out.shape)])
        out_shape = (jax.ShapeDtypeStruct((n_pad, feat), jnp.float32),
                     jax.ShapeDtypeStruct((num_mems, s, n_pad), jnp.float32))
        out_specs = (pl.BlockSpec((rb, feat), lambda i: (i, 0)),
                     pl.BlockSpec((num_mems, s, rb), lambda i: (0, 0, i)))
        flops = 2 * n_pad * (feat * s + (num_mems - 1) * s * s + s * feat)
        transcendentals = n_pad * s * num_mems  # exp in softmax

    in_bytes = sum(int(a.size) * a.dtype.itemsize for a in operands)
    out_bytes = sum(math.prod(o.shape) * o.dtype.itemsize for o in out_shape)
    cost = pl.CostEstimate(flops=int(flops),
                           transcendentals=int(transcendentals),
                           bytes_accessed=int(in_bytes + out_bytes))

    kernel = functools.partial(_fused_kernel, num_mems=num_mems,
                               shrink_thres=float(shrink_thres))

    outs = pl.pallas_call(
        kernel,
        out_shape=out_shape,
        grid=grid,
        in_specs=in_specs,
        out_specs=out_specs,
        compiler_params=pltpu.CompilerParams(
            dimension_semantics=("parallel",),
            vmem_limit_bytes=32 * 1024 * 1024),
        cost_estimate=cost,
    )(*operands)

    recon = outs[0][:n] if n_pad != n else outs[0]
    if num_mems == 0:
        return recon, None
    att = jnp.transpose(outs[1], (0, 2, 1))          # (M, n_pad, S)
    if n_pad != n:
        att = att[:, :n, :]
    return recon, att


# -----------------------------------------------------------------------------
# Model
# -----------------------------------------------------------------------------
class MLMemAESCPallas:
    def __init__(self, num_in_ch, seq_len, feature_dim, features_root,
                 num_slots, shrink_thres, mem_usage, skip_ops, key):
        self.num_in_ch = num_in_ch
        self.seq_len = seq_len
        self.feature_dim = feature_dim
        self.features_root = features_root
        self.num_slots = num_slots
        self.shrink_thres = shrink_thres
        self.mem_usage = mem_usage
        self.num_mem = sum(mem_usage)     # reference-parity bookkeeping
        self.skip_ops = skip_ops

        keys = jax.random.split(key, 8)

        # nn.Linear default init: U(-1/sqrt(fan_in), 1/sqrt(fan_in)) for W and b.
        def linear_init(kw, kb, dout, din):
            bound = 1.0 / math.sqrt(din)
            w = jax.random.uniform(kw, (dout, din), jnp.float32, -bound, bound)
            b = jax.random.uniform(kb, (dout,), jnp.float32, -bound, bound)
            return w, b

        fc_in_w, fc_in_b = linear_init(keys[0], keys[1], features_root, feature_dim)
        fc_out_w, fc_out_b = linear_init(keys[2], keys[3], feature_dim, features_root)

        fc_in_wt = fc_in_w.T                        # [feature_dim, features_root]
        fc_in_b2 = fc_in_b.reshape(1, features_root)
        fc_out_wt = fc_out_w.T                      # [features_root, feature_dim]
        fc_out_b2 = fc_out_b.reshape(1, feature_dim)

        # Memory.reset_parameters: U(-1/sqrt(slot_dim), 1/sqrt(slot_dim))
        stdv = 1.0 / math.sqrt(features_root)

        def mem_init(k):
            return jax.random.uniform(k, (num_slots, features_root),
                                      jnp.float32, -stdv, stdv)

        mem1 = mem_init(keys[4]) if mem_usage[1] else None
        mem2 = mem_init(keys[5]) if mem_usage[2] else None
        mem3 = mem_init(keys[6]) if mem_usage[3] else None

        # Memories are applied in order mem3 -> mem2 -> mem1 (reference order).
        mems, order = [], []
        if mem_usage[3]:
            mems.append(mem3); order.append(3)
        if mem_usage[2]:
            mems.append(mem2); order.append(2)
        if mem_usage[1]:
            mems.append(mem1); order.append(1)
        self.mem_order = order
        self.num_active_mems = len(mems)

        # ------------------------------------------------------------------
        # Algebraic fold (exact; only FP rounding order changes):
        #   logits_0 = x @ (W_in^T @ mem_0^T) + b_in @ mem_0^T
        #   logits_k = att_{k-1} @ (mem_{k-1} @ mem_k^T)
        #   recon    = att_last @ (mem_last @ W_out^T) + b_out
        # ------------------------------------------------------------------
        if self.num_active_mems > 0:
            self.w0 = fc_in_wt @ mems[0].T                 # [feat, S]
            self.b0 = fc_in_b2 @ mems[0].T                 # [1, S]
            self.c_mats = [mems[k] @ mems[k + 1].T         # [S, S]
                           for k in range(self.num_active_mems - 1)]
            self.m_out = mems[-1] @ fc_out_wt              # [S, feat]
            self.b_out = fc_out_b2                         # [1, feat]
        else:
            self.w0 = fc_in_wt @ fc_out_wt                 # [feat, feat]
            self.b0 = fc_in_b2 @ fc_out_wt + fc_out_b2     # [1, feat]
            self.c_mats, self.m_out, self.b_out = [], None, None

    def __call__(self, x):
        # x: [bs, seq_len, 1, feature_dim]
        bs, seq_len, _, _ = x.shape
        x2d = x.reshape(bs * seq_len, -1)

        recon2d, att_stack = fused_forward(
            x2d, self.w0, self.b0, self.c_mats, self.m_out, self.b_out,
            self.num_active_mems, self.num_slots, self.shrink_thres)
        recon = recon2d.reshape(bs, seq_len, 1, -1)

        atts = {}
        if att_stack is not None:
            for idx, lvl in enumerate(self.mem_order):
                atts[lvl] = att_stack[idx]
        att_weight3 = atts.get(3)
        att_weight2 = atts.get(2)
        att_weight1 = atts.get(1)

        if self.num_mem == 3:
            return dict(recon=recon, att_weight3=att_weight3,
                        att_weight2=att_weight2, att_weight1=att_weight1)

        # Reference builds zeros_like(att_weight3) for num_mem in {1, 2};
        # fall back to whichever att actually exists so we never zeros_like(None).
        template = (next(a for a in (att_weight3, att_weight2, att_weight1)
                         if a is not None)
                    if self.num_active_mems > 0 else None)
        if self.num_mem == 2:
            return dict(recon=recon, att_weight3=att_weight3,
                        att_weight2=att_weight2,
                        att_weight1=jnp.zeros_like(template))
        if self.num_mem == 1:
            return dict(recon=recon, att_weight3=att_weight3,
                        att_weight2=jnp.zeros_like(template),
                        att_weight1=jnp.zeros_like(template))
        # TODO(synk): num_mem == 0 is undefined in the reference module too.
        return dict(recon=recon)


# -----------------------------------------------------------------------------
# Main
# -----------------------------------------------------------------------------
if __name__ == "__main__":
    key = jax.random.PRNGKey(0)
    k_param, k_x = jax.random.split(key)

    bs, seq_len, feature_dim = 2, 8, 32
    features_root, num_slots = 32, 8

    model = MLMemAESCPallas(
        num_in_ch=1,
        seq_len=seq_len,
        feature_dim=feature_dim,
        features_root=features_root,
        num_slots=num_slots,
        shrink_thres=0.0025,
        mem_usage=[0, 1, 1, 1],   # mem1, mem2, mem3 all active -> num_mem == 3
        skip_ops=[],
        key=k_param,
    )

    x = jax.random.normal(k_x, (bs, seq_len, 1, feature_dim), jnp.float32)

    outs = model(x)
    outs = jax.tree_util.tree_map(jax.block_until_ready, outs)

    assert outs["recon"].shape == (bs, seq_len, 1, feature_dim)
    assert outs["att_weight1"].shape == (bs * seq_len, num_slots)
    assert outs["att_weight2"].shape == (bs * seq_len, num_slots)
    assert outs["att_weight3"].shape == (bs * seq_len, num_slots)
    assert bool(jnp.all(jnp.isfinite(outs["recon"])))
    assert bool(jnp.all(jnp.isfinite(outs["att_weight1"])))

    print("KERNEL_OK")
</pallas_src>

<mosaic_0001>
module attributes {stable_mosaic.version = 11 : i64} {
  func.func @_fused_kernel(%arg0: i32, %arg1: memref<16x32xf32, #tpu.memory_space<vmem>>, %arg2: memref<32x8xf32, #tpu.memory_space<vmem>>, %arg3: memref<1x8xf32, #tpu.memory_space<vmem>>, %arg4: memref<8x8xf32, #tpu.memory_space<vmem>>, %arg5: memref<8x8xf32, #tpu.memory_space<vmem>>, %arg6: memref<8x32xf32, #tpu.memory_space<vmem>>, %arg7: memref<1x32xf32, #tpu.memory_space<vmem>>, %arg8: memref<16x32xf32, #tpu.memory_space<vmem>>, %arg9: memref<3x8x16xf32, #tpu.memory_space<vmem>>) attributes {dimension_semantics = [#tpu.dimension_semantics<parallel>], iteration_bounds = array<i64: 1>, scalar_prefetch = 0 : i64, scratch_operands = 0 : i64, tpu.core_type = #tpu.core_type<tc>, window_params = [{transform_indices = @transform_0, window_bounds = array<i64: 16, 32>}, {pipeline_mode = #tpu.pipeline_mode<synchronous>, transform_indices = @transform_1, window_bounds = array<i64: 32, 8>}, {pipeline_mode = #tpu.pipeline_mode<synchronous>, transform_indices = @transform_2, window_bounds = array<i64: 1, 8>}, {pipeline_mode = #tpu.pipeline_mode<synchronous>, transform_indices = @transform_3, window_bounds = array<i64: 8, 8>}, {pipeline_mode = #tpu.pipeline_mode<synchronous>, transform_indices = @transform_4, window_bounds = array<i64: 8, 8>}, {pipeline_mode = #tpu.pipeline_mode<synchronous>, transform_indices = @transform_5, window_bounds = array<i64: 8, 32>}, {pipeline_mode = #tpu.pipeline_mode<synchronous>, transform_indices = @transform_6, window_bounds = array<i64: 1, 32>}, {transform_indices = @transform_7, window_bounds = array<i64: 16, 32>}, {transform_indices = @transform_8, window_bounds = array<i64: 3, 8, 16>}]} {
    %c0 = arith.constant 0 : index
    %c0_0 = arith.constant 0 : index
    %0 = vector.load %arg1[%c0, %c0_0] : memref<16x32xf32, #tpu.memory_space<vmem>>, vector<16x32xf32>
    %c0_1 = arith.constant 0 : index
    %c0_2 = arith.constant 0 : index
    %1 = vector.load %arg2[%c0_1, %c0_2] : memref<32x8xf32, #tpu.memory_space<vmem>>, vector<32x8xf32>
    %cst = arith.constant dense<0.000000e+00> : vector<16x8xf32>
    %2 = tpu.matmul %0, %1, %cst {dimension_numbers = #tpu.dot_dimension_numbers<[1], [0], [0], [1], [0, 0, 1, 1], [], []>} : vector<16x32xf32>, vector<32x8xf32>, vector<16x8xf32> -> vector<16x8xf32>
    %c0_3 = arith.constant 0 : index
    %c0_4 = arith.constant 0 : index
    %3 = vector.load %arg3[%c0_3, %c0_4] : memref<1x8xf32, #tpu.memory_space<vmem>>, vector<1x8xf32>
    %4 = vector.broadcast %3 : vector<1x8xf32> to vector<16x8xf32>
    %5 = arith.addf %2, %4 : vector<16x8xf32>
    %cst_5 = arith.constant dense<0xFF800000> : vector<16xf32>
    %6 = vector.multi_reduction <maximumf>, %5, %cst_5 [1] : vector<16x8xf32> to vector<16xf32>
    %7 = vector.shape_cast %6 : vector<16xf32> to vector<16x1xf32>
    %8 = vector.broadcast %7 : vector<16x1xf32> to vector<16x8xf32>
    %9 = arith.subf %5, %8 : vector<16x8xf32>
    %10 = math.exp %9 : vector<16x8xf32>
    %cst_6 = arith.constant dense<0.000000e+00> : vector<16xf32>
    %11 = vector.multi_reduction <add>, %10, %cst_6 [1] : vector<16x8xf32> to vector<16xf32>
    %12 = vector.shape_cast %11 : vector<16xf32> to vector<16x1xf32>
    %13 = tpu.reciprocal %12 {approx = true} : vector<16x1xf32> -> vector<16x1xf32>
    %14 = vector.broadcast %13 : vector<16x1xf32> to vector<16x8xf32>
    %15 = arith.mulf %10, %14 : vector<16x8xf32>
    %cst_7 = arith.constant 2.500000e-03 : f32
    %16 = vector.broadcast %cst_7 : f32 to vector<16x8xf32>
    %17 = arith.subf %15, %16 : vector<16x8xf32>
    %cst_8 = arith.constant 0.000000e+00 : f32
    %18 = vector.broadcast %cst_8 : f32 to vector<16x8xf32>
    %19 = arith.maximumf %17, %18 : vector<16x8xf32>
    %20 = arith.mulf %19, %15 : vector<16x8xf32>
    %21 = math.absf %17 : vector<16x8xf32>
    %cst_9 = arith.constant 9.99999996E-13 : f32
    %22 = vector.broadcast %cst_9 : f32 to vector<16x8xf32>
    %23 = arith.addf %21, %22 : vector<16x8xf32>
    %24 = arith.divf %20, %23 : vector<16x8xf32>
    %25 = math.absf %24 : vector<16x8xf32>
    %cst_10 = arith.constant dense<0.000000e+00> : vector<16xf32>
    %26 = vector.multi_reduction <add>, %25, %cst_10 [1] : vector<16x8xf32> to vector<16xf32>
    %27 = vector.shape_cast %26 : vector<16xf32> to vector<16x1xf32>
    %cst_11 = arith.constant 9.99999996E-13 : f32
    %28 = vector.broadcast %cst_11 : f32 to vector<16x1xf32>
    %29 = arith.maximumf %27, %28 : vector<16x1xf32>
    %30 = vector.broadcast %29 : vector<16x1xf32> to vector<16x8xf32>
    %31 = arith.divf %24, %30 : vector<16x8xf32>
    %32 = tpu.transpose %31, [1, 0] : vector<16x8xf32> -> vector<8x16xf32>
    %c0_12 = arith.constant 0 : index
    %c0_13 = arith.constant 0 : index
    %c0_14 = arith.constant 0 : index
    %33 = vector.load %arg9[%c0_12, %c0_13, %c0_14] : memref<3x8x16xf32, #tpu.memory_space<vmem>>, vector<1x8x16xf32>
    %34 = vector.shape_cast %33 : vector<1x8x16xf32> to vector<8x16xf32>
    %35 = vector.shape_cast %32 : vector<8x16xf32> to vector<1x8x16xf32>
    tpu.vector_store %arg9[%c0_12, %c0_13, %c0_14], %35 {strides = array<i32>} : memref<3x8x16xf32, #tpu.memory_space<vmem>>, vector<1x8x16xf32>,
    %c0_15 = arith.constant 0 : index
    %c0_16 = arith.constant 0 : index
    %36 = vector.load %arg4[%c0_15, %c0_16] : memref<8x8xf32, #tpu.memory_space<vmem>>, vector<8x8xf32>
    %cst_17 = arith.constant dense<0.000000e+00> : vector<16x8xf32>
    %37 = tpu.matmul %31, %36, %cst_17 {dimension_numbers = #tpu.dot_dimension_numbers<[1], [0], [0], [1], [0, 0, 1, 1], [], []>} : vector<16x8xf32>, vector<8x8xf32>, vector<16x8xf32> -> vector<16x8xf32>
    %cst_18 = arith.constant dense<0xFF800000> : vector<16xf32>
    %38 = vector.multi_reduction <maximumf>, %37, %cst_18 [1] : vector<16x8xf32> to vector<16xf32>
    %39 = vector.shape_cast %38 : vector<16xf32> to vector<16x1xf32>
    %40 = vector.broadcast %39 : vector<16x1xf32> to vector<16x8xf32>
    %41 = arith.subf %37, %40 : vector<16x8xf32>
    %42 = math.exp %41 : vector<16x8xf32>
    %cst_19 = arith.constant dense<0.000000e+00> : vector<16xf32>
    %43 = vector.multi_reduction <add>, %42, %cst_19 [1] : vector<16x8xf32> to vector<16xf32>
    %44 = vector.shape_cast %43 : vector<16xf32> to vector<16x1xf32>
    %45 = tpu.reciprocal %44 {approx = true} : vector<16x1xf32> -> vector<16x1xf32>
    %46 = vector.broadcast %45 : vector<16x1xf32> to vector<16x8xf32>
    %47 = arith.mulf %42, %46 : vector<16x8xf32>
    %cst_20 = arith.constant 2.500000e-03 : f32
    %48 = vector.broadcast %cst_20 : f32 to vector<16x8xf32>
    %49 = arith.subf %47, %48 : vector<16x8xf32>
    %cst_21 = arith.constant 0.000000e+00 : f32
    %50 = vector.broadcast %cst_21 : f32 to vector<16x8xf32>
    %51 = arith.maximumf %49, %50 : vector<16x8xf32>
    %52 = arith.mulf %51, %47 : vector<16x8xf32>
    %53 = math.absf %49 : vector<16x8xf32>
    %cst_22 = arith.constant 9.99999996E-13 : f32
    %54 = vector.broadcast %cst_22 : f32 to vector<16x8xf32>
    %55 = arith.addf %53, %54 : vector<16x8xf32>
    %56 = arith.divf %52, %55 : vector<16x8xf32>
    %57 = math.absf %56 : vector<16x8xf32>
    %cst_23 = arith.constant dense<0.000000e+00> : vector<16xf32>
    %58 = vector.multi_reduction <add>, %57, %cst_23 [1] : vector<16x8xf32> to vector<16xf32>
    %59 = vector.shape_cast %58 : vector<16xf32> to vector<16x1xf32>
    %cst_24 = arith.constant 9.99999996E-13 : f32
    %60 = vector.broadcast %cst_24 : f32 to vector<16x1xf32>
    %61 = arith.maximumf %59, %60 : vector<16x1xf32>
    %62 = vector.broadcast %61 : vector<16x1xf32> to vector<16x8xf32>
    %63 = arith.divf %56, %62 : vector<16x8xf32>
    %64 = tpu.transpose %63, [1, 0] : vector<16x8xf32> -> vector<8x16xf32>
    %c1 = arith.constant 1 : index
    %c0_25 = arith.constant 0 : index
    %c0_26 = arith.constant 0 : index
    %65 = vector.load %arg9[%c1, %c0_25, %c0_26] : memref<3x8x16xf32, #tpu.memory_space<vmem>>, vector<1x8x16xf32>
    %66 = vector.shape_cast %65 : vector<1x8x16xf32> to vector<8x16xf32>
    %67 = vector.shape_cast %64 : vector<8x16xf32> to vector<1x8x16xf32>
    tpu.vector_store %arg9[%c1, %c0_25, %c0_26], %67 {strides = array<i32>} : memref<3x8x16xf32, #tpu.memory_space<vmem>>, vector<1x8x16xf32>,
    %c0_27 = arith.constant 0 : index
    %c0_28 = arith.constant 0 : index
    %68 = vector.load %arg5[%c0_27, %c0_28] : memref<8x8xf32, #tpu.memory_space<vmem>>, vector<8x8xf32>
    %cst_29 = arith.constant dense<0.000000e+00> : vector<16x8xf32>
    %69 = tpu.matmul %63, %68, %cst_29 {dimension_numbers = #tpu.dot_dimension_numbers<[1], [0], [0], [1], [0, 0, 1, 1], [], []>} : vector<16x8xf32>, vector<8x8xf32>, vector<16x8xf32> -> vector<16x8xf32>
    %cst_30 = arith.constant dense<0xFF800000> : vector<16xf32>
    %70 = vector.multi_reduction <maximumf>, %69, %cst_30 [1] : vector<16x8xf32> to vector<16xf32>
    %71 = vector.shape_cast %70 : vector<16xf32> to vector<16x1xf32>
    %72 = vector.broadcast %71 : vector<16x1xf32> to vector<16x8xf32>
    %73 = arith.subf %69, %72 : vector<16x8xf32>
    %74 = math.exp %73 : vector<16x8xf32>
    %cst_31 = arith.constant dense<0.000000e+00> : vector<16xf32>
    %75 = vector.multi_reduction <add>, %74, %cst_31 [1] : vector<16x8xf32> to vector<16xf32>
    %76 = vector.shape_cast %75 : vector<16xf32> to vector<16x1xf32>
    %77 = tpu.reciprocal %76 {approx = true} : vector<16x1xf32> -> vector<16x1xf32>
    %78 = vector.broadcast %77 : vector<16x1xf32> to vector<16x8xf32>
    %79 = arith.mulf %74, %78 : vector<16x8xf32>
    %cst_32 = arith.constant 2.500000e-03 : f32
    %80 = vector.broadcast %cst_32 : f32 to vector<16x8xf32>
    %81 = arith.subf %79, %80 : vector<16x8xf32>
    %cst_33 = arith.constant 0.000000e+00 : f32
    %82 = vector.broadcast %cst_33 : f32 to vector<16x8xf32>
    %83 = arith.maximumf %81, %82 : vector<16x8xf32>
    %84 = arith.mulf %83, %79 : vector<16x8xf32>
    %85 = math.absf %81 : vector<16x8xf32>
    %cst_34 = arith.constant 9.99999996E-13 : f32
    %86 = vector.broadcast %cst_34 : f32 to vector<16x8xf32>
    %87 = arith.addf %85, %86 : vector<16x8xf32>
    %88 = arith.divf %84, %87 : vector<16x8xf32>
    %89 = math.absf %88 : vector<16x8xf32>
    %cst_35 = arith.constant dense<0.000000e+00> : vector<16xf32>
    %90 = vector.multi_reduction <add>, %89, %cst_35 [1] : vector<16x8xf32> to vector<16xf32>
    %91 = vector.shape_cast %90 : vector<16xf32> to vector<16x1xf32>
    %cst_36 = arith.constant 9.99999996E-13 : f32
    %92 = vector.broadcast %cst_36 : f32 to vector<16x1xf32>
    %93 = arith.maximumf %91, %92 : vector<16x1xf32>
    %94 = vector.broadcast %93 : vector<16x1xf32> to vector<16x8xf32>
    %95 = arith.divf %88, %94 : vector<16x8xf32>
    %96 = tpu.transpose %95, [1, 0] : vector<16x8xf32> -> vector<8x16xf32>
    %c2 = arith.constant 2 : index
    %c0_37 = arith.constant 0 : index
    %c0_38 = arith.constant 0 : index
    %97 = vector.load %arg9[%c2, %c0_37, %c0_38] : memref<3x8x16xf32, #tpu.memory_space<vmem>>, vector<1x8x16xf32>
    %98 = vector.shape_cast %97 : vector<1x8x16xf32> to vector<8x16xf32>
    %99 = vector.shape_cast %96 : vector<8x16xf32> to vector<1x8x16xf32>
    tpu.vector_store %arg9[%c2, %c0_37, %c0_38], %99 {strides = array<i32>} : memref<3x8x16xf32, #tpu.memory_space<vmem>>, vector<1x8x16xf32>,
    %c0_39 = arith.constant 0 : index
    %c0_40 = arith.constant 0 : index
    %100 = vector.load %arg6[%c0_39, %c0_40] : memref<8x32xf32, #tpu.memory_space<vmem>>, vector<8x32xf32>
    %cst_41 = arith.constant dense<0.000000e+00> : vector<16x32xf32>
    %101 = tpu.matmul %95, %100, %cst_41 {dimension_numbers = #tpu.dot_dimension_numbers<[1], [0], [0], [1], [0, 0, 1, 1], [], []>} : vector<16x8xf32>, vector<8x32xf32>, vector<16x32xf32> -> vector<16x32xf32>
    %c0_42 = arith.constant 0 : index
    %c0_43 = arith.constant 0 : index
    %102 = vector.load %arg7[%c0_42, %c0_43] : memref<1x32xf32, #tpu.memory_space<vmem>>, vector<1x32xf32>
    %103 = vector.broadcast %102 : vector<1x32xf32> to vector<16x32xf32>
    %104 = arith.addf %101, %103 : vector<16x32xf32>
    %c0_44 = arith.constant 0 : index
    %c0_45 = arith.constant 0 : index
    %105 = vector.load %arg8[%c0_44, %c0_45] : memref<16x32xf32, #tpu.memory_space<vmem>>, vector<16x32xf32>
    tpu.vector_store %arg8[%c0_44, %c0_45], %104 {strides = array<i32>} : memref<16x32xf32, #tpu.memory_space<vmem>>, vector<16x32xf32>,
    return
  }
  func.func @transform_0(%arg0: i32) -> (i32, i32) {
    %c0_i32 = arith.constant 0 : i32
    %c0_i32_0 = arith.constant 0 : i32
    return %arg0, %c0_i32 : i32, i32
  }
  func.func @transform_1(%arg0: i32) -> (i32, i32) {
    %c0_i32 = arith.constant 0 : i32
    %c0_i32_0 = arith.constant 0 : i32
    %c0_i32_1 = arith.constant 0 : i32
    return %c0_i32, %c0_i32_0 : i32, i32
  }
  func.func @transform_2(%arg0: i32) -> (i32, i32) {
    %c0_i32 = arith.constant 0 : i32
    %c0_i32_0 = arith.constant 0 : i32
    %c0_i32_1 = arith.constant 0 : i32
    return %c0_i32, %c0_i32_0 : i32, i32
  }
  func.func @transform_3(%arg0: i32) -> (i32, i32) {
    %c0_i32 = arith.constant 0 : i32
    %c0_i32_0 = arith.constant 0 : i32
    %c0_i32_1 = arith.constant 0 : i32
    return %c0_i32, %c0_i32_0 : i32, i32
  }
  func.func @transform_4(%arg0: i32) -> (i32, i32) {
    %c0_i32 = arith.constant 0 : i32
    %c0_i32_0 = arith.constant 0 : i32
    %c0_i32_1 = arith.constant 0 : i32
    return %c0_i32, %c0_i32_0 : i32, i32
  }
  func.func @transform_5(%arg0: i32) -> (i32, i32) {
    %c0_i32 = arith.constant 0 : i32
    %c0_i32_0 = arith.constant 0 : i32
    %c0_i32_1 = arith.constant 0 : i32
    return %c0_i32, %c0_i32_0 : i32, i32
  }
  func.func @transform_6(%arg0: i32) -> (i32, i32) {
    %c0_i32 = arith.constant 0 : i32
    %c0_i32_0 = arith.constant 0 : i32
    %c0_i32_1 = arith.constant 0 : i32
    return %c0_i32, %c0_i32_0 : i32, i32
  }
  func.func @transform_7(%arg0: i32) -> (i32, i32) {
    %c0_i32 = arith.constant 0 : i32
    %c0_i32_0 = arith.constant 0 : i32
    return %arg0, %c0_i32 : i32, i32
  }
  func.func @transform_8(%arg0: i32) -> (i32, i32, i32) {
    %c0_i32 = arith.constant 0 : i32
    %c0_i32_0 = arith.constant 0 : i32
    %c0_i32_1 = arith.constant 0 : i32
    return %c0_i32, %c0_i32_0, %arg0 : i32, i32, i32
  }
}

</mosaic_0001>

<bundles_post_ra>
// kernel: tpu_custom_call.1
= control target key start
LH: loop header
LB: loop body
LE: loop exit
PB: predicated region body
PF: predicated region fallthrough
CT: control target
= control target key end

     0   :  { %14 = vsyncpa [#allocation3], 0  ;;  %vm43_vm0 = vcmask 261120   ;;  %s973_s0 = inlined_call_operand.vmem [shape: f32[16,32], index: 0, kind: input, shape index: {}]   ;;  %s974_s1 = inlined_call_operand.vmem [shape: f32[32,8], index: 1, kind: input, shape index: {}]   ;;  %s975_s2 = inlined_call_operand.vmem [shape: f32[1,8], index: 2, kind: input, shape index: {}]   ;;  %s976_s3 = inlined_call_operand.vmem [shape: f32[8,8], index: 3, kind: input, shape index: {}]   ;;  %s977_s4 = inlined_call_operand.vmem [shape: f32[8,8], index: 4, kind: input, shape index: {}]   ;;  %s978_s5 = inlined_call_operand.vmem [shape: f32[8,32], index: 5, kind: input, shape index: {}]   ;;  %s979_s6 = inlined_call_operand.vmem [shape: f32[1,32], index: 6, kind: input, shape index: {}]   ;;  %s980_s7 = inlined_call_operand.hbm [shape: f32[16,32], index: 7, kind: output, shape index: {0}]   ;;  %s981_s8 = inlined_call_operand.hbm [shape: f32[3,8,16], index: 8, kind: output, shape index: {1}]  }
   0x1   :  { %v32_v0 = vld [vmem:[%s974_s1] sm:$0xff]  ;;  %v33_v1 = vld [vmem:[%s974_s1 + $0x8] sm:$0xff]  ;;  %v34_v2 = vld [vmem:[%s974_s1 + $0x10] sm:$0xff] }
   0x2   :  { %v722_v3 = vpack.c.bf16 %v33_v1, %v32_v0  ;;  %v35_v4 = vld [vmem:[%s974_s1 + $0x18] sm:$0xff]  ;;  %v30_v5 = vld [vmem:[%s973_s0] sm:$0xff] }
   0x3   :  { %v726_v6 = vpack.c.bf16 %v35_v4, %v34_v2  ;;  %704 = vmatprep.mubr.msk.f32.mxu0 %vm43_vm0, %v30_v5 }
   0x4   :  { %15 = vsyncpa [#allocation5], 0  ;;  %723 = vmatprep.subr.bf16.mxu0 %v722_v3  ;;  %v31_v7 = vld [vmem:[%s973_s0 + $0x8] sm:$0xff]  ;;  %v665_v8 = vld [vmem:[%s975_s2] ss:$0 sm:$0xff]  ;;  %vm125_vm1 = vcmask 64512  }
   0x5   :  { %725 = vmatpush3.bf16.msra.mxu0 %v722_v3  ;;  %v210_v49 = vld [vmem:[%s976_s3] sm:$0xff]  ;;  %vm208_vm2 = vcmask 130048  }
   0x6   :  { %727 = vmatprep.subr.bf16.mxu0 %v726_v6  ;;  %707 = vmatprep.subr.mxu1 %v210_v49 }
   0x7   :  { %708 = vmatpush3.msra.mxu1 %v210_v49 }
   0x9   :  { %729 = vmatpush3.bf16.msra.mxu0 %v726_v6 }
   0xc   :  { %705 = vmatmul.mubr.msk.f32.vlgmr.msra.gmra.mrb[0].mxu0 %vm43_vm0, %v31_v7 }
  0xdf   :  { %v706_v9 = vpop.f32.mrb[0].mxu0 }
  0xe0   :  { %v116_v10 = vpop.f32.mrb[1].mxu0  ;;  %v122_v12 = vadd.f32 %v706_v9, %v665_v8 }
  0xe1   :  { %v117_v11 = vadd.f32 %v665_v8, %v116_v10 }
  0xe2   :  { %v129_v14 = vsel %vm125_vm1, %v122_v12, -inf }
  0xe3   :  { %v126_v13 = vsel %vm125_vm1, %v117_v11, -inf }
  0xe4   :  { %127 = vmax.xlane.f32.xlu0 %v126_v13 }
  0xe8   :  { %130 = vmax.xlane.f32.xlu0 %v129_v14 }
 0x171   :  { %v128_v15 = vpop.xlane.xlu0 %127 }
 0x172   :  { %v132_v16 = vsub.f32 %v117_v11, %v128_v15 }
 0x174   :  { %v134_v17 = vmul.f32 1.442695, %v132_v16 }
 0x175   :  { %v131_v18 = vpop.xlane.xlu0 %130 }
 0x176   :  { %735 = vpow2.f32 %v134_v17  ;;  %v133_v19 = vsub.f32 %v122_v12, %v131_v18 }
 0x178   :  { %v136_v20 = vmul.f32 1.442695, %v133_v19 }
 0x17a   :  { %737 = vpow2.f32 %v136_v20 }
 0x180   :  { %v736_v21 = vpop.eup %735 }
 0x181   :  { %v138_v22 = vsel %vm125_vm1, %v736_v21, 0.0 }
 0x182   :  { %139 = vadd.xlane.f32.xlu1 %v138_v22 }
 0x184   :  { %v738_v23 = vpop.eup %737 }
 0x185   :  { %v141_v24 = vsel %vm125_vm1, %v738_v23, 0.0 }
 0x186   :  { %142 = vadd.xlane.f32.xlu1 %v141_v24 }
 0x20f   :  { %v140_v25 = vpop.xlane.xlu1 %139 }
 0x210   :  { %739 = vrcp.f32 %v140_v25 }
 0x213   :  { %v143_v26 = vpop.xlane.xlu1 %142 }
 0x214   :  { %741 = vrcp.f32 %v143_v26 }
 0x21a   :  { %v740_v27 = vpop.eup %739 }
 0x21b   :  { %v146_v28 = vmul.f32 %v740_v27, %v736_v21 }
 0x21d   :  { %v668_v29 = vadd.f32 -0.0025, %v146_v28 }
 0x21e   :  { %v742_v30 = vpop.eup %741 }
 0x21f   :  { %v154_v31 = vand.u32 2147483647, %v668_v29  ;;  %v147_v32 = vmul.f32 %v742_v30, %v738_v23  ;;  %v150_v37 = vmax.f32 %v668_v29, 0.0 }
 0x221   :  { %v156_v33 = vadd.f32 1e-12, %v154_v31  ;;  %v669_v34 = vadd.f32 -0.0025, %v147_v32  ;;  %v152_v38 = vmul.f32 %v150_v37, %v146_v28 }
 0x223   :  { %743 = vrcp.f32 %v156_v33  ;;  %v155_v35 = vand.u32 2147483647, %v669_v34  ;;  %v151_v39 = vmax.f32 %v669_v34, 0.0 }
 0x225   :  { %v157_v36 = vadd.f32 1e-12, %v155_v35  ;;  %v153_v43 = vmul.f32 %v151_v39, %v147_v32  ;;  %v376_v32 = vld [vmem:[%s977_s4] sm:$0xff] }
 0x226   :  { %712 = vmatprep.subr.mxu1 %v376_v32 }
 0x227   :  { %745 = vrcp.f32 %v157_v36 }
 0x22d   :  { %v744_v40 = vpop.eup %743 }
 0x22e   :  { %v159_v41 = vmul.f32 %v744_v40, %v152_v38 }
 0x230   :  { %v162_v42 = vand.u32 2147483647, %v159_v41 }
 0x231   :  { %v746_v44 = vpop.eup %745 }
 0x232   :  { %v164_v45 = vsel %vm125_vm1, %v162_v42, 0.0  ;;  %v161_v46 = vmul.f32 %v746_v44, %v153_v43 }
 0x233   :  { %165 = vadd.xlane.f32.xlu0 %v164_v45 }
 0x234   :  { %v163_v47 = vand.u32 2147483647, %v161_v46 }
 0x236   :  { %v167_v48 = vsel %vm125_vm1, %v163_v47, 0.0 }
 0x237   :  { %168 = vadd.xlane.f32.xlu1 %v167_v48 }
 0x2c0   :  { %v166_v50 = vpop.xlane.xlu0 %165 }
 0x2c1   :  { %v170_v51 = vmax.f32 %v166_v50, 1e-12 }
 0x2c3   :  { %747 = vrcp.f32 %v170_v51 }
 0x2c4   :  { %v169_v52 = vpop.xlane.xlu1 %168 }
 0x2c5   :  { %v171_v53 = vmax.f32 %v169_v52, 1e-12 }
 0x2c7   :  { %749 = vrcp.f32 %v171_v53 }
 0x2cd   :  { %v748_v54 = vpop.eup %747 }
 0x2ce   :  { %v912_v55 = vmul.f32 %v748_v54, %v159_v41 }
 0x2d0   :  { %709 = vmatprep.mubr.msk.f32.mxu1 %vm125_vm1, %v912_v55 }
 0x2d1   :  { %v750_v56 = vpop.eup %749 }
 0x2d2   :  { %v916_v57 = vmul.f32 %v750_v56, %v161_v46 }
 0x2d4   :  { %710 = vmatmul.mubr.msk.f32.vlgmr.msra.gmra.mrb[0].mxu1 %vm125_vm1, %v916_v57 }
 0x2d5   :  { %713 = vmatpush3.msra.mxu1 %v376_v32 }
 0x3a7   :  { %v711_v58 = vpop.f32.mrb[0].mxu1 }
 0x3a8   :  { %v283_v59 = vpop.f32.mrb[1].mxu1  ;;  %v295_v60 = vsel %vm125_vm1, %v711_v58, -inf }
 0x3a9   :  { %296 = vmax.xlane.f32.xlu1 %v295_v60  ;;  %v292_v61 = vsel %vm125_vm1, %v283_v59, -inf }
 0x3aa   :  { %293 = vmax.xlane.f32.xlu0 %v292_v61 }
 0x436   :  { %v297_v62 = vpop.xlane.xlu1 %296 }
 0x437   :  { %v299_v63 = vsub.f32 %v711_v58, %v297_v62  ;;  %v294_v0 = vpop.xlane.xlu0 %293 }
 0x438   :  { %v298_v1 = vsub.f32 %v283_v59, %v294_v0 }
 0x439   :  { %v302_v2 = vmul.f32 1.442695, %v299_v63 }
 0x43a   :  { %v300_v3 = vmul.f32 1.442695, %v298_v1 }
 0x43b   :  { %751 = vpow2.f32 %v302_v2 }
 0x43c   :  { %753 = vpow2.f32 %v300_v3 }
 0x445   :  { %v752_v4 = vpop.eup %751 }
 0x446   :  { %v754_v5 = vpop.eup %753  ;;  %v307_v6 = vsel %vm125_vm1, %v752_v4, 0.0 }
 0x447   :  { %308 = vadd.xlane.f32.xlu1 %v307_v6  ;;  %v304_v7 = vsel %vm125_vm1, %v754_v5, 0.0 }
 0x448   :  { %305 = vadd.xlane.f32.xlu0 %v304_v7 }
 0x4d4   :  { %v309_v8 = vpop.xlane.xlu1 %308 }
 0x4d5   :  { %755 = vrcp.f32 %v309_v8  ;;  %v306_v9 = vpop.xlane.xlu0 %305 }
 0x4d6   :  { %757 = vrcp.f32 %v306_v9 }
 0x4df   :  { %v756_v10 = vpop.eup %755 }
 0x4e0   :  { %v758_v11 = vpop.eup %757  ;;  %v313_v12 = vmul.f32 %v756_v10, %v752_v4 }
 0x4e1   :  { %v312_v13 = vmul.f32 %v758_v11, %v754_v5 }
 0x4e2   :  { %v673_v14 = vadd.f32 -0.0025, %v313_v12 }
 0x4e3   :  { %v672_v15 = vadd.f32 -0.0025, %v312_v13 }
 0x4e4   :  { %v321_v16 = vand.u32 2147483647, %v673_v14  ;;  %v317_v20 = vmax.f32 %v673_v14, 0.0 }
 0x4e5   :  { %v320_v17 = vand.u32 2147483647, %v672_v15  ;;  %v316_v21 = vmax.f32 %v672_v15, 0.0 }
 0x4e6   :  { %v323_v18 = vadd.f32 1e-12, %v321_v16  ;;  %v319_v22 = vmul.f32 %v317_v20, %v313_v12 }
 0x4e7   :  { %v322_v19 = vadd.f32 1e-12, %v320_v17  ;;  %v318_v24 = vmul.f32 %v316_v21, %v312_v13  ;;  %v542_v17 = vld [vmem:[%s978_s5] sm:$0xff]  ;;  %s831_s5 = smov [#allocation4]  }
 0x4e8   :  { %759 = vrcp.f32 %v323_v18  ;;  %717 = vmatprep.subr.mxu1 %v542_v17  ;;  %s650_s20 = sshll.u32 %s831_s5, 4  ;;  %s651_s20 = int_to_ptr.vmem [resolvable:$true] %s650_s20 }
 0x4e9   :  { %761 = vrcp.f32 %v322_v19  ;;  %s783_s21 = scalar_lea.vmem %s651_s20, 384  ;;  %p788_p1 = scmp.lt.s32.totalorder %s651_s20, %s651_s20 }
 0x4ea   :  { %p784_p0 = scmp.ne.s32.totalorder %s651_s20, %s783_s21  ;;  %p789_p2 = scmp.lt.s32.totalorder %s783_s21, %s783_s21 }
 0x4ec   :  { %p790_p3 = por %p789_p2, %p788_p1 }
 0x4ee   :  { %p791_p4 = pnand %p790_p3, %p784_p0 }
 0x4f2   :  { %v760_v23 = vpop.eup %759 }
 0x4f3   :  { %v762_v25 = vpop.eup %761  ;;  %v327_v26 = vmul.f32 %v760_v23, %v319_v22 }
 0x4f4   :  { %v325_v27 = vmul.f32 %v762_v25, %v318_v24 }
 0x4f5   :  { %v329_v28 = vand.u32 2147483647, %v327_v26 }
 0x4f6   :  { %v328_v29 = vand.u32 2147483647, %v325_v27 }
 0x4f7   :  { %v333_v30 = vsel %vm125_vm1, %v329_v28, 0.0 }
 0x4f8   :  { %334 = vadd.xlane.f32.xlu1 %v333_v30  ;;  %v330_v31 = vsel %vm125_vm1, %v328_v29, 0.0 }
 0x4f9   :  { %331 = vadd.xlane.f32.xlu0 %v330_v31 }
 0x585   :  { %v335_v33 = vpop.xlane.xlu1 %334 }
 0x586   :  { %v337_v34 = vmax.f32 %v335_v33, 1e-12  ;;  %v332_v35 = vpop.xlane.xlu0 %331 }
 0x587   :  { %v336_v36 = vmax.f32 %v332_v35, 1e-12 }
 0x588   :  { %763 = vrcp.f32 %v337_v34 }
 0x589   :  { %765 = vrcp.f32 %v336_v36 }
 0x592   :  { %v764_v37 = vpop.eup %763 }
 0x593   :  { %v766_v38 = vpop.eup %765  ;;  %v341_v40 = vmul.f32 %v764_v37, %v327_v26 }
 0x594   :  { %v339_v39 = vmul.f32 %v766_v38, %v325_v27 }
 0x596   :  { %714 = vmatprep.mubr.msk.f32.mxu1 %vm125_vm1, %v339_v39 }
 0x597   :  { %715 = vmatmul.mubr.msk.f32.vlgmr.msra.gmra.mrb[2].mxu1 %vm125_vm1, %v341_v40 }
 0x598   :  { %718 = vmatpush3.msra.mxu1 %v542_v17 }
 0x66a   :  { %v716_v41 = vpop.f32.mrb[2].mxu1 }
 0x66b   :  { %v449_v42 = vpop.f32.mrb[3].mxu1  ;;  %v461_v43 = vsel %vm125_vm1, %v716_v41, -inf }
 0x66c   :  { %462 = vmax.xlane.f32.xlu1 %v461_v43  ;;  %v458_v44 = vsel %vm125_vm1, %v449_v42, -inf }
 0x66d   :  { %459 = vmax.xlane.f32.xlu0 %v458_v44 }
 0x6f9   :  { %v463_v45 = vpop.xlane.xlu1 %462 }
 0x6fa   :  { %v465_v46 = vsub.f32 %v716_v41, %v463_v45  ;;  %v460_v47 = vpop.xlane.xlu0 %459 }
 0x6fb   :  { %v464_v48 = vsub.f32 %v449_v42, %v460_v47 }
 0x6fc   :  { %v468_v49 = vmul.f32 1.442695, %v465_v46 }
 0x6fd   :  { %v466_v50 = vmul.f32 1.442695, %v464_v48 }
 0x6fe   :  { %767 = vpow2.f32 %v468_v49 }
 0x6ff   :  { %769 = vpow2.f32 %v466_v50 }
 0x708   :  { %v768_v51 = vpop.eup %767 }
 0x709   :  { %v770_v52 = vpop.eup %769  ;;  %v473_v53 = vsel %vm125_vm1, %v768_v51, 0.0 }
 0x70a   :  { %474 = vadd.xlane.f32.xlu1 %v473_v53  ;;  %v470_v54 = vsel %vm125_vm1, %v770_v52, 0.0 }
 0x70b   :  { %471 = vadd.xlane.f32.xlu0 %v470_v54 }
 0x797   :  { %v475_v56 = vpop.xlane.xlu1 %474 }
 0x798   :  { %771 = vrcp.f32 %v475_v56  ;;  %v472_v58 = vpop.xlane.xlu0 %471 }
 0x799   :  { %773 = vrcp.f32 %v472_v58 }
 0x7a2   :  { %v772_v59 = vpop.eup %771 }
 0x7a3   :  { %v774_v60 = vpop.eup %773  ;;  %v479_v61 = vmul.f32 %v772_v59, %v768_v51 }
 0x7a4   :  { %v478_v62 = vmul.f32 %v774_v60, %v770_v52 }
 0x7a5   :  { %v677_v63 = vadd.f32 -0.0025, %v479_v61 }
 0x7a6   :  { %v676_v0 = vadd.f32 -0.0025, %v478_v62 }
 0x7a7   :  { %v487_v1 = vand.u32 2147483647, %v677_v63  ;;  %v483_v5 = vmax.f32 %v677_v63, 0.0 }
 0x7a8   :  { %v486_v2 = vand.u32 2147483647, %v676_v0  ;;  %v482_v6 = vmax.f32 %v676_v0, 0.0 }
 0x7a9   :  { %v489_v3 = vadd.f32 1e-12, %v487_v1  ;;  %v485_v7 = vmul.f32 %v483_v5, %v479_v61 }
 0x7aa   :  { %v488_v4 = vadd.f32 1e-12, %v486_v2  ;;  %v484_v9 = vmul.f32 %v482_v6, %v478_v62 }
 0x7ab   :  { %775 = vrcp.f32 %v489_v3 }
 0x7ac   :  { %777 = vrcp.f32 %v488_v4 }
 0x7b5   :  { %v776_v8 = vpop.eup %775 }
 0x7b6   :  { %v778_v10 = vpop.eup %777  ;;  %v493_v11 = vmul.f32 %v776_v8, %v485_v7 }
 0x7b7   :  { %v491_v12 = vmul.f32 %v778_v10, %v484_v9 }
 0x7b8   :  { %v495_v13 = vand.u32 2147483647, %v493_v11 }
 0x7b9   :  { %v494_v14 = vand.u32 2147483647, %v491_v12 }
 0x7ba   :  { %v499_v15 = vsel %vm125_vm1, %v495_v13, 0.0 }
 0x7bb   :  { %500 = vadd.xlane.f32.xlu1 %v499_v15  ;;  %v496_v16 = vsel %vm125_vm1, %v494_v14, 0.0 }
 0x7bc   :  { %497 = vadd.xlane.f32.xlu0 %v496_v16 }
 0x7e9   :  { %176 = vxpose.xlu0.b32.start [1/2] (short) (narrow) %v912_v55, 8 }
 0x7ed   :  { %177 = vxpose.xlu0.b32.end [2/2] (short) (narrow) %v916_v57, 8 }
 0x7ee   :  { %342 = vxpose.xlu1.b32.start [1/2] (short) (narrow) %v339_v39, 8 }
 0x7f2   :  { %343 = vxpose.xlu1.b32.end [2/2] (short) (narrow) %v341_v40, 8 }
 0x848   :  { %v501_v18 = vpop.xlane.xlu1 %500 }
 0x849   :  { %v503_v19 = vmax.f32 %v501_v18, 1e-12  ;;  %v498_v20 = vpop.xlane.xlu0 %497 }
 0x84a   :  { %v502_v21 = vmax.f32 %v498_v20, 1e-12 }
 0x84b   :  { %779 = vrcp.f32 %v503_v19 }
 0x84c   :  { %781 = vrcp.f32 %v502_v21 }
 0x855   :  { %v780_v22 = vpop.eup %779 }
 0x856   :  { %v782_v23 = vpop.eup %781  ;;  %v507_v25 = vmul.f32 %v780_v22, %v493_v11 }
 0x857   :  { %v505_v24 = vmul.f32 %v782_v23, %v491_v12 }
 0x859   :  { %508 = vxpose.xlu0.b32.start [1/2] (short) (narrow) %v505_v24, 8  ;;  %719 = vmatprep.mubr.msk.f32.mxu1 %vm125_vm1, %v505_v24 }
 0x85a   :  { %720 = vmatmul.mubr.msk.f32.vlgmr.msra.gmra.mrb[4].mxu1 %vm125_vm1, %v507_v25 }
 0x85d   :  { %509 = vxpose.xlu0.b32.end [2/2] (short) (narrow) %v507_v25, 8 }
 0x869   :  { %v192_v55 = vpop.trf.xlu0 }
 0x86a   :  { %209 = vst.msk [vmem:[#allocation4] sm:$0xff] %vm208_vm2, %v192_v55 }
 0x86e   :  { %v358_v57 = vpop.trf.xlu1 }
 0x86f   :  { %375 = vst.msk [vmem:[#allocation4 + $0x8] sm:$0xff] %vm208_vm2, %v358_v57 }
 0x8d9   :  { %v524_v26 = vpop.trf.xlu0 }
 0x8da   :  { %541 = vst.msk [vmem:[#allocation4 + $0x10] sm:$0xff] %vm208_vm2, %v524_v26 }
 0x8db   :  { %794 = shalt.err (!%p791_p4)
}
 0x8dc   :  { %s795_s24 = scalar_lea.hbm %s981_s8, 384 }
 0x8dd   :  { %p796_p5 = scmp.ne.s32.totalorder %s981_s8, %s795_s24  ;;  %p799_p6 = scmp.lt.u32.totalorder %s795_s24, %s981_s8 }
 0x8df   :  { %p801_p7 = pnand %p799_p6, %p796_p5 }
 0x8e1   :  { %804 = shalt.err (!%p801_p7)
}
 0x8e2   :  { %s832_s29 = smov 128   ;;  %s833_s30 = smov 8   ;;  %v678_v27 = vld [vmem:[%s979_s6] ss:$0 sm:$0xff] }
 0x8e3   :  { %656 = dma.vmem_to_hbm [thread:$0]  %s651_s20, 384, %s981_s8, [#allocation5], %s832_s29, %s832_s29, %s833_s30  }
 0x8e4   :  { %s834_s13 = smov [#allocation2]  }
 0x8e5   :  { %s638_s14 = sshll.u32 %s834_s13, 4  ;;  %s639_s14 = int_to_ptr.vmem [resolvable:$true] %s638_s14 }
 0x8e6   :  { %s805_s15 = scalar_lea.vmem %s639_s14, 256  ;;  %p810_p9 = scmp.lt.s32.totalorder %s639_s14, %s639_s14 }
 0x8e7   :  { %p806_p8 = scmp.ne.s32.totalorder %s639_s14, %s805_s15  ;;  %p811_p10 = scmp.lt.s32.totalorder %s805_s15, %s805_s15 }
 0x8e9   :  { %p812_p11 = por %p811_p10, %p810_p9 }
 0x8eb   :  { %p813_p12 = pnand %p812_p11, %p806_p8 }
 0x92d   :  { %v721_v28 = vpop.f32.mrb[4].mxu1 }
 0x92e   :  { %v628_v29 = vadd.f32 %v721_v28, %v678_v27  ;;  %v622_v30 = vpop.f32.mrb[5].mxu1 }
 0x92f   :  { %v623_v31 = vadd.f32 %v678_v27, %v622_v30 }
 0x930   :  { %632 = vst.msk [vmem:[#allocation2 + $0x8] sm:$0xff] %vm43_vm0, %v628_v29 }
 0x931   :  { %631 = vst.msk [vmem:[#allocation2] sm:$0xff] %vm43_vm0, %v623_v31 }
 0x932   :  { %816 = shalt.err (!%p813_p12)
}
 0x933   :  { %s817_s16 = scalar_lea.hbm %s980_s7, 256 }
 0x934   :  { %p818_p13 = scmp.ne.s32.totalorder %s980_s7, %s817_s16  ;;  %p821_p0 = scmp.lt.u32.totalorder %s817_s16, %s980_s7 }
 0x936   :  { %p823_p1 = pnand %p821_p0, %p818_p13 }
 0x938   :  { %826 = shalt.err (!%p823_p1)
}
 0x939   :  { %644 = dma.vmem_to_hbm [thread:$0]  %s639_s14, 256, %s980_s7, [#allocation3], %s832_s29, %s832_s29, %s833_s30  }
 0x93a   :  { %827 = dma.done.wait [#allocation3], 256  }
 0x93b   :  { %828 = vsyncadd [#allocation3], 4294967040 }
 0x93c   :  { %829 = dma.done.wait [#allocation5], 384  }
 0x93d   :  { %830 = vsyncadd [#allocation5], 4294966912 }
 0x93e   :  { %663 = vsyncpa [#allocation3], 1 }
 0x93f   :  { %664 = vsyncpa [#allocation5], 1 }

</bundles_post_ra>
